<compile_context>
chip_gen: v6e
topology: v6e:2x2x1
jax: 0.10.0
libtpu: 0.0.40
codegen_flags: <defaults>
</compile_context>

<pallas_src>
import jax
import jax.numpy as jnp
from jax import lax
from jax.experimental import pallas as pl
from jax.experimental.pallas import tpu as pltpu


def _predictor_kernel(x_ref, w_ref, b_ref, o_ref):
    # x_ref: (n_t, K) VMEM (input dtype)    w_ref: (2, K) VMEM (input dtype,
    #   pre-scaled by 1/HW and channel-expanded)
    # b_ref: (1, 2) f32 VMEM                o_ref: (n_t, 2) VMEM
    logits = lax.dot_general(
        x_ref[...], w_ref[...],
        dimension_numbers=(((1,), (1,)), ((), ())),   # contract K with K
        preferred_element_type=jnp.float32,
    )                                                 # (n_t, 2), f32 accum on MXU
    o_ref[...] = jnp.tanh(logits + b_ref[...]).astype(o_ref.dtype)


def _choose_n_tile(n, k, itemsize):
    """Batch tile: ~8 MiB of x per block (multiple of 8 rows), but keep at
    least ~4 grid steps when N allows so the DMA/compute pipeline has work to
    overlap and v7x can shard steps across its two TensorCores."""
    if n <= 8:
        return int(n)
    row_bytes = max(k * itemsize, 1)
    target_bytes = 8 << 20                       # ~8 MiB x block (v6e sweet spot)
    n_t = max(8, (target_bytes // row_bytes) // 8 * 8)
    n_t = min(n_t, max(8, (n // 4) // 8 * 8))    # >= ~4 steps when N is big enough
    if n_t >= n:
        return int(n)
    return int(n_t)


def fast_rcnn_predictor_padreg_bidirection(x, weight, bias):
    """x: (N, C, H, W); weight: (2, C) (torch nn.Linear layout); bias: (2,)."""
    N, C, H, W = x.shape
    HW = H * W
    K = C * HW
    itemsize = jnp.dtype(x.dtype).itemsize

    # Glue reshape in plain JAX: contiguous NCHW flatten, index = c*HW + h*W + w.
    x2 = x.reshape(N, K)

    # Fold the 1/HW average-pool into the weight and expand it to K so the
    # kernel is a single matmul: w_k[o, c*HW + s] = weight[o, c] / HW.
    w_expanded = jnp.repeat(
        weight.astype(jnp.float32) / jnp.float32(HW), HW, axis=1
    ).astype(x.dtype)                                   # (2, K), torch layout
    b = bias.astype(jnp.float32).reshape(1, 2)          # (1, 2) f32 VMEM operand

    # Batch tiling; ragged last block instead of padding (no extra HBM copy).
    n_t = _choose_n_tile(N, K, itemsize)
    grid = (pl.cdiv(N, n_t),)

    # VMEM budget from the actual (double-buffered, tile-padded) footprint.
    k_pad = ((K + 127) // 128) * 128
    rows_pad = ((n_t + 7) // 8) * 8
    x_block_bytes = rows_pad * k_pad * itemsize
    w_block_bytes = 8 * k_pad * jnp.dtype(w_expanded.dtype).itemsize
    out_block_bytes = rows_pad * 128 * itemsize
    vmem_limit = 2 * x_block_bytes + 2 * w_block_bytes + 2 * out_block_bytes + (2 << 20)
    vmem_limit = int(min(max(vmem_limit, 4 << 20), 56 << 20))   # headroom under v7x 64 MiB

    cost = pl.CostEstimate(
        flops=2 * N * K * 2 + 2 * N * 2,
        transcendentals=2 * N,
        bytes_accessed=(N * K * itemsize
                        + 2 * K * jnp.dtype(w_expanded.dtype).itemsize
                        + 2 * 4
                        + N * 2 * itemsize),
    )

    out = pl.pallas_call(
        _predictor_kernel,
        out_shape=jax.ShapeDtypeStruct((N, 2), x.dtype),
        grid=grid,
        in_specs=[
            pl.BlockSpec((n_t, K), lambda i: (i, 0)),    # x tile (streamed, lane-dense)
            pl.BlockSpec((2, K), lambda i: (0, 0)),      # expanded weight (resident)
            pl.BlockSpec((1, 2), lambda i: (0, 0)),      # bias (resident)
        ],
        out_specs=pl.BlockSpec((n_t, 2), lambda i: (i, 0)),
        compiler_params=pltpu.CompilerParams(
            dimension_semantics=("parallel",),
            vmem_limit_bytes=vmem_limit,
        ),
        cost_estimate=cost,
    )(x2, w_expanded, b)

    return out


if __name__ == "__main__":
    key = jax.random.PRNGKey(0)
    k_x, k_w, k_b = jax.random.split(key, 3)

    # Small shapes consistent with the module: batch=2, in_channels=4, spatial=16x16.
    N, C, H, W = 2, 4, 16, 16
    x = jax.random.normal(k_x, (N, C, H, W), dtype=jnp.float32)

    # Deterministic nn.Linear(C, 2)-style init: U(-1/sqrt(C), 1/sqrt(C)).
    bound = 1.0 / (C ** 0.5)
    weight = jax.random.uniform(k_w, (2, C), minval=-bound, maxval=bound,
                                dtype=jnp.float32)
    bias = jax.random.uniform(k_b, (2,), minval=-bound, maxval=bound,
                              dtype=jnp.float32)

    reg_val = fast_rcnn_predictor_padreg_bidirection(x, weight, bias)
    jax.block_until_ready(reg_val)

    # Pure-JAX reference check of the same math (avgpool -> linear -> tanh).
    pooled_ref = jnp.mean(x.reshape(N, C, -1), axis=-1)
    ref = jnp.tanh(pooled_ref @ weight.T + bias)
    assert reg_val.shape == (N, 2)
    assert jnp.allclose(reg_val, ref, atol=1e-5, rtol=1e-5)

    print("KERNEL_OK")
</pallas_src>

<mosaic_0001>
module attributes {stable_mosaic.version = 11 : i64} {
  func.func @_predictor_kernel(%arg0: i32, %arg1: memref<2x1024xf32, #tpu.memory_space<vmem>>, %arg2: memref<2x1024xf32, #tpu.memory_space<vmem>>, %arg3: memref<1x2xf32, #tpu.memory_space<vmem>>, %arg4: memref<2x2xf32, #tpu.memory_space<vmem>>) attributes {dimension_semantics = [#tpu.dimension_semantics<parallel>], iteration_bounds = array<i64: 1>, scalar_prefetch = 0 : i64, scratch_operands = 0 : i64, tpu.core_type = #tpu.core_type<tc>, window_params = [{transform_indices = @transform_0, window_bounds = array<i64: 2, 1024>}, {pipeline_mode = #tpu.pipeline_mode<synchronous>, transform_indices = @transform_1, window_bounds = array<i64: 2, 1024>}, {pipeline_mode = #tpu.pipeline_mode<synchronous>, transform_indices = @transform_2, window_bounds = array<i64: 1, 2>}, {transform_indices = @transform_3, window_bounds = array<i64: 2, 2>}]} {
    %c0 = arith.constant 0 : index
    %c0_0 = arith.constant 0 : index
    %0 = vector.load %arg1[%c0, %c0_0] : memref<2x1024xf32, #tpu.memory_space<vmem>>, vector<2x1024xf32>
    %c0_1 = arith.constant 0 : index
    %c0_2 = arith.constant 0 : index
    %1 = vector.load %arg2[%c0_1, %c0_2] : memref<2x1024xf32, #tpu.memory_space<vmem>>, vector<2x1024xf32>
    %cst = arith.constant dense<0.000000e+00> : vector<2x2xf32>
    %2 = tpu.matmul %0, %1, %cst {dimension_numbers = #tpu.dot_dimension_numbers<[1], [1], [0], [0], [0, 0, 1, 0], [], []>} : vector<2x1024xf32>, vector<2x1024xf32>, vector<2x2xf32> -> vector<2x2xf32>
    %c0_3 = arith.constant 0 : index
    %c0_4 = arith.constant 0 : index
    %3 = vector.load %arg3[%c0_3, %c0_4] : memref<1x2xf32, #tpu.memory_space<vmem>>, vector<1x2xf32>
    %4 = vector.broadcast %3 : vector<1x2xf32> to vector<2x2xf32>
    %5 = arith.addf %2, %4 : vector<2x2xf32>
    %6 = math.tanh %5 : vector<2x2xf32>
    %c0_5 = arith.constant 0 : index
    %c0_6 = arith.constant 0 : index
    %7 = vector.load %arg4[%c0_5, %c0_6] : memref<2x2xf32, #tpu.memory_space<vmem>>, vector<2x2xf32>
    tpu.vector_store %arg4[%c0_5, %c0_6], %6 {strides = array<i32>} : memref<2x2xf32, #tpu.memory_space<vmem>>, vector<2x2xf32>,
    return
  }
  func.func @transform_0(%arg0: i32) -> (i32, i32) {
    %c0_i32 = arith.constant 0 : i32
    %c0_i32_0 = arith.constant 0 : i32
    return %arg0, %c0_i32 : i32, i32
  }
  func.func @transform_1(%arg0: i32) -> (i32, i32) {
    %c0_i32 = arith.constant 0 : i32
    %c0_i32_0 = arith.constant 0 : i32
    %c0_i32_1 = arith.constant 0 : i32
    return %c0_i32, %c0_i32_0 : i32, i32
  }
  func.func @transform_2(%arg0: i32) -> (i32, i32) {
    %c0_i32 = arith.constant 0 : i32
    %c0_i32_0 = arith.constant 0 : i32
    %c0_i32_1 = arith.constant 0 : i32
    return %c0_i32, %c0_i32_0 : i32, i32
  }
  func.func @transform_3(%arg0: i32) -> (i32, i32) {
    %c0_i32 = arith.constant 0 : i32
    %c0_i32_0 = arith.constant 0 : i32
    return %arg0, %c0_i32 : i32, i32
  }
}

</mosaic_0001>

<bundles_post_ra>
// kernel: tpu_custom_call.1
= control target key start
LH: loop header
LB: loop body
LE: loop exit
PB: predicated region body
PF: predicated region fallthrough
CT: control target
= control target key end

     0   :  { %8 = vsyncpa [#allocation3], 0  ;;  %s550_s0 = inlined_call_operand.hbm [shape: f32[2,1024], index: 0, kind: input, shape index: {}]   ;;  %s551_s1 = inlined_call_operand.hbm [shape: f32[2,1024], index: 1, kind: input, shape index: {}]   ;;  %s552_s2 = inlined_call_operand.vmem [shape: f32[1,2], index: 2, kind: input, shape index: {}]   ;;  %s553_s3 = inlined_call_operand.hbm [shape: f32[2,2], index: 3, kind: output, shape index: {}]  }
   0x1   :  { %9 = vsyncpa [#allocation6], 0 }
   0x2   :  { %10 = vsyncpa [#allocation4], 0  ;;  %s514_s12 = smov [#allocation2]   ;;  %s515_s14 = smov [#allocation5]  }
   0x3   :  { %s17_s13 = sshll.u32 %s514_s12, 4  ;;  %s27_s15 = sshll.u32 %s515_s14, 4  ;;  %s18_s13 = int_to_ptr.vmem [resolvable:$true] %s17_s13  ;;  %s28_s15 = int_to_ptr.vmem [resolvable:$true] %s27_s15 }
   0x4   :  { %s456_s16 = scalar_lea.vmem %s18_s13, 256  ;;  %p461_p1 = scmp.lt.s32.totalorder %s18_s13, %s18_s13 }
   0x5   :  { %p457_p0 = scmp.ne.s32.totalorder %s18_s13, %s456_s16  ;;  %p462_p2 = scmp.lt.s32.totalorder %s456_s16, %s456_s16 }
   0x7   :  { %p463_p3 = por %p462_p2, %p461_p1 }
   0x9   :  { %p464_p4 = pnand %p463_p3, %p457_p0 }
   0xb   :  { %467 = shalt.err (!%p464_p4)
}
   0xc   :  { %20 = dma.hbm_to_vmem [thread:$0]  %s550_s0, 256, %s18_s13, [#allocation3]  }
   0xd   :  { %s476_s19 = scalar_lea.vmem %s28_s15, 256  ;;  %p481_p6 = scmp.lt.s32.totalorder %s28_s15, %s28_s15 }
   0xe   :  { %p477_p5 = scmp.ne.s32.totalorder %s28_s15, %s476_s19  ;;  %p482_p7 = scmp.lt.s32.totalorder %s476_s19, %s476_s19 }
  0x10   :  { %p483_p8 = por %p482_p7, %p481_p6 }
  0x12   :  { %p484_p9 = pnand %p483_p8, %p477_p5 }
  0x14   :  { %487 = shalt.err (!%p484_p9)
}
  0x15   :  { %30 = dma.hbm_to_vmem [thread:$0]  %s551_s1, 256, %s28_s15, [#allocation6]  }
  0x16   :  { %508 = dma.done.wait [#allocation3], 256  }
  0x17   :  { %509 = vsyncadd [#allocation3], 4294967040 }
  0x18   :  { %510 = dma.done.wait [#allocation6], 256  }
  0x19   :  { %511 = vsyncadd [#allocation6], 4294967040  ;;  %v56_v0 = vlaneseq  ;;  %v516_v1 = vmov 1983009808   ;;  %v41_v6 = vld [vmem:[#allocation5] sm:$0xff]  ;;  %v39_v7 = vld [vmem:[#allocation2] sm:$0xff] }
  0x1a   :  { %v54_v2 = vunpack.c.l.s4 %v516_v1  ;;  %v42_v8 = vld [vmem:[#allocation5 + $0x8] sm:$0xff]  ;;  %v96_v10 = vcombine.high %v41_v6, %v41_v6  ;;  %v40_v13 = vld [vmem:[#allocation2 + $0x8] sm:$0xff]  ;;  %v52_v14 = vcombine.high %v39_v7, %v39_v7  ;;  %v437_v30 = vld [vmem:[%s552_s2] ss:$0 sm:$0xff]  ;;  %s517_s22 = smov [#allocation7]   ;;  %vm419_vm0 = vcmask 9216  }
  0x1b   :  { %v57_v3 = vshrl.u32 %v56_v0, 7  ;;  %v113_v15 = vcombine.high %v42_v8, %v42_v8  ;;  %v69_v17 = vcombine.high %v40_v13, %v40_v13  ;;  %s427_s23 = sshll.u32 %s517_s22, 4  ;;  %s428_s23 = int_to_ptr.vmem [resolvable:$true] %s427_s23 }
  0x1c   :  { %v55_v4 = vunpack.c.0.s8 %v54_v2  ;;  %s488_s2 = scalar_lea.vmem %s428_s23, 32  ;;  %p493_p11 = scmp.lt.s32.totalorder %s428_s23, %s428_s23 }
  0x1d   :  { %p489_p10 = scmp.ne.s32.totalorder %s428_s23, %s488_s2  ;;  %p494_p12 = scmp.lt.s32.totalorder %s488_s2, %s488_s2 }
  0x1e   :  { %v58_v5 = vsub.s32 %v55_v4, %v57_v3 }
  0x1f   :  { %p495_p13 = por %p494_p12, %p493_p11 }
  0x20   :  { %v103_v9 = vrot.slane %v41_v6, %v58_v5  ;;  %v59_v11 = vrot.slane %v39_v7, %v58_v5  ;;  %v120_v12 = vrot.slane %v42_v8, %v58_v5  ;;  %v76_v16 = vrot.slane %v40_v13, %v58_v5 }
  0x21   :  { %v110_v19 = vrot.slane %v96_v10, %v58_v5  ;;  %v66_v22 = vrot.slane %v52_v14, %v58_v5  ;;  %v127_v23 = vrot.slane %v113_v15, %v58_v5  ;;  %v83_v24 = vrot.slane %v69_v17, %v58_v5  ;;  %p496_p0 = pnand %p495_p13, %p489_p10 }
  0x22   :  { %v111_v18 = vcombine.high %v103_v9, %v103_v9  ;;  %v67_v20 = vcombine.high %v59_v11, %v59_v11  ;;  %v128_v21 = vcombine.high %v120_v12, %v120_v12  ;;  %v84_v28 = vcombine.high %v76_v16, %v76_v16 }
  0x23   :  { %v112_v25 = vcombine.high %v110_v19, %v110_v19  ;;  %v68_v26 = vcombine.high %v66_v22, %v66_v22  ;;  %v129_v27 = vcombine.high %v127_v23, %v127_v23  ;;  %v85_v29 = vcombine.high %v83_v24, %v83_v24 }
  0x24   :  { %168 = vmatprep.subr.mxu0 %v111_v18  ;;  %202 = vmatprep.mubr.f32.mxu0 %v67_v20 }
  0x25   :  { %169 = vmatpush1.xpose.msra.mxu0 %v103_v9  ;;  %238 = vmatprep.subr.mxu1 %v112_v25 }
  0x26   :  { %308 = vmatprep.subr.mxu0 %v128_v21  ;;  %239 = vmatpush1.xpose.msra.mxu1 %v110_v19 }
  0x27   :  { %272 = vmatprep.mubr.f32.mxu1 %v68_v26  ;;  %378 = vmatprep.subr.mxu1 %v129_v27 }
  0x28   :  { %203 = vmatmul.mubr.f32.vlgmr.msra.gmra.mxu0 %v59_v11 }
  0x29   :  { %309 = vmatpush1.xpose.msra.mxu0 %v120_v12  ;;  %342 = vmatprep.mubr.f32.mxu0 %v84_v28 }
  0x2a   :  { %273 = vmatmul.mubr.f32.vlgmr.msra.gmra.mxu1 %v66_v22 }
  0x2b   :  { %379 = vmatpush1.xpose.msra.mxu1 %v127_v23  ;;  %412 = vmatprep.mubr.f32.mxu1 %v85_v29 }
  0x2c   :  { %343 = vmatmul.mubr.f32.vlgmr.msra.gmra.mxu0 %v76_v16 }
  0x2e   :  { %413 = vmatmul.mubr.f32.vlgmr.msra.gmra.mxu1 %v83_v24 }
  0xe8   :  { %v204_v31 = vpop.f32.mrf.mxu0 }
  0xe9   :  { %v205_v32 = vadd.f32 %v437_v30, %v204_v31 }
  0xea   :  { %v206_v33 = vpop.f32.mrf.mxu0  ;;  %v274_v34 = vpop.f32.mrf.mxu1 }
  0xeb   :  { %v275_v35 = vadd.f32 %v274_v34, %v205_v32 }
  0xec   :  { %v276_v36 = vpop.f32.mrf.mxu1  ;;  %v344_v37 = vpop.f32.mrf.mxu0 }
  0xed   :  { %v345_v38 = vadd.f32 %v344_v37, %v275_v35 }
  0xee   :  { %v346_v39 = vpop.f32.mrf.mxu0  ;;  %v414_v40 = vpop.f32.mrf.mxu1 }
  0xef   :  { %v415_v41 = vadd.f32 %v414_v40, %v345_v38 }
  0xf0   :  { %v416_v42 = vpop.f32.mrf.mxu1 }
  0xf1   :  { %446 = vtanh.f32 %v415_v41 }
  0xfe   :  { %v447_v43 = vpop.eup %446 }
  0xff   :  { %420 = vst.msk [vmem:[#allocation7] sm:$0x3] %vm419_vm0, %v447_v43 }
 0x100   :  { %499 = shalt.err (!%p496_p0)
}
 0x101   :  { %430 = dma.vmem_to_hbm [thread:$0]  %s428_s23, 32, %s553_s3, [#allocation4]  }
 0x102   :  { %512 = dma.done.wait [#allocation4], 32  }
 0x103   :  { %513 = vsyncadd [#allocation4], 4294967264 }
 0x104   :  { %434 = vsyncpa [#allocation3], 1 }
 0x105   :  { %435 = vsyncpa [#allocation6], 1 }
 0x106   :  { %436 = vsyncpa [#allocation4], 1 }

</bundles_post_ra>
